<compile_context>
chip_gen: v7x
topology: tpu7x:2x2x1
jax: 0.10.0
libtpu: 0.0.40
codegen_flags: <defaults>
</compile_context>

<pallas_src>
import jax
import jax.numpy as jnp
from jax.experimental import pallas as pl
from jax.experimental.pallas import tpu as pltpu

LANE = 128   # lane width: feature dims AND node count padded to this


def _round_up(v, m):
    return (v + m - 1) // m * m


def _pad2(arr, rows, cols):
    r, c = arr.shape
    return jnp.pad(arr, ((0, rows - r), (0, cols - c)))


# ---------------------------------------------------------------------------
# Fused Pallas kernel: both SAGEConv layers in one invocation
# ---------------------------------------------------------------------------
def _graphsage_fused_kernel(a_ref, x_ref, wl1_ref, wr1_ref, b1_ref,
                            wl2_ref, wr2_ref, b2_ref, o_ref):
    # a_ref  : [Np, Np]   bf16 row-normalized adjacency (mean aggregation)
    # x_ref  : [Np, Cp]   bf16 node features (zero-padded)
    # wl1/wr1: [Cp, Hp]   bf16      b1: [1, Hp] f32
    # wl2/wr2: [Hp, Op]   bf16      b2: [1, Op] f32
    # o_ref  : [Np, Op]   f32  (lane-dense, Op multiple of 128)
    a = a_ref[...]
    x = x_ref[...]

    # ---- layer 1: h = relu(A@x @ Wl1 + x @ Wr1 + b1) ----
    agg1 = jnp.dot(a, x, preferred_element_type=jnp.float32).astype(jnp.bfloat16)
    h = (jnp.dot(agg1, wl1_ref[...], preferred_element_type=jnp.float32)
         + jnp.dot(x, wr1_ref[...], preferred_element_type=jnp.float32)
         + b1_ref[...])
    h = jnp.maximum(h, 0.0).astype(jnp.bfloat16)   # stays in VMEM/vregs, never hits HBM

    # ---- layer 2: out = A @ (h @ Wl2) + h @ Wr2 + b2 ----
    hl = jnp.dot(h, wl2_ref[...], preferred_element_type=jnp.float32).astype(jnp.bfloat16)
    out = (jnp.dot(a, hl, preferred_element_type=jnp.float32)
           + jnp.dot(h, wr2_ref[...], preferred_element_type=jnp.float32)
           + b2_ref[...])

    o_ref[...] = out.astype(o_ref.dtype)


def graphsage_forward(a_mean, x_pad, wl1, wr1, b1, wl2, wr2, b2,
                      *, num_nodes, out_channels):
    n_pad = a_mean.shape[0]
    out_p = wl2.shape[1]
    full = lambda shape: pl.BlockSpec(shape, lambda i: (0, 0))
    out = pl.pallas_call(
        _graphsage_fused_kernel,
        out_shape=jax.ShapeDtypeStruct((n_pad, out_p), jnp.float32),
        grid=(1,),
        in_specs=[
            full(a_mean.shape), full(x_pad.shape),
            full(wl1.shape), full(wr1.shape), full(b1.shape),
            full(wl2.shape), full(wr2.shape), full(b2.shape),
        ],
        out_specs=pl.BlockSpec((n_pad, out_p), lambda i: (0, 0)),
        compiler_params=pltpu.CompilerParams(
            dimension_semantics=("arbitrary",),
            vmem_limit_bytes=32 * 1024 * 1024,   # safe on v5e/v6e/v7x scoped limits
        ),
    )(a_mean, x_pad, wl1, wr1, b1, wl2, wr2, b2)
    return out[:num_nodes, :out_channels]


# ---------------------------------------------------------------------------
# Glue (plain JAX): build the mean-aggregation matrix ONCE, pad, cast to bf16
# ---------------------------------------------------------------------------
def mean_adjacency(edge_index, num_nodes, n_pad):
    # edge_index[0] = source j, edge_index[1] = target i  (message j -> i)
    src, dst = edge_index[0], edge_index[1]
    adj = jnp.zeros((num_nodes, num_nodes), jnp.float32)
    adj = adj.at[dst, src].add(1.0)
    deg = adj.sum(axis=1, keepdims=True)
    inv_deg = jnp.where(deg > 0, 1.0 / deg, 0.0)
    a = adj * inv_deg
    a = jnp.pad(a, ((0, n_pad - num_nodes), (0, n_pad - num_nodes)))
    return a.astype(jnp.bfloat16)


def prepare_params(params, in_channels, hidden_channels, out_channels):
    """Pad weights/biases to lane-dense shapes, cast matmul operands to bf16."""
    cin_p = _round_up(in_channels, LANE)
    h_p = _round_up(hidden_channels, LANE)
    out_p = _round_up(out_channels, LANE)

    wl1 = _pad2(params["w_l1"], cin_p, h_p).astype(jnp.bfloat16)
    wr1 = _pad2(params["w_r1"], cin_p, h_p).astype(jnp.bfloat16)
    b1 = _pad2(params["b1"], 1, h_p).astype(jnp.float32)

    wl2 = _pad2(params["w_l2"], h_p, out_p).astype(jnp.bfloat16)
    wr2 = _pad2(params["w_r2"], h_p, out_p).astype(jnp.bfloat16)
    b2 = _pad2(params["b2"], 1, out_p).astype(jnp.float32)
    return wl1, wr1, b1, wl2, wr2, b2


def init_params(key, in_channels, hidden_channels, out_channels):
    ks = jax.random.split(key, 6)

    def glorot(k, fan_in, fan_out):
        lim = (6.0 / (fan_in + fan_out)) ** 0.5
        return jax.random.uniform(k, (fan_in, fan_out), jnp.float32, -lim, lim)

    return {
        "w_l1": glorot(ks[0], in_channels, hidden_channels),
        "w_r1": glorot(ks[1], in_channels, hidden_channels),
        "b1": jnp.zeros((1, hidden_channels), jnp.float32),
        "w_l2": glorot(ks[2], hidden_channels, out_channels),
        "w_r2": glorot(ks[3], hidden_channels, out_channels),
        "b2": jnp.zeros((1, out_channels), jnp.float32),
    }


# ---------------------------------------------------------------------------
# Pure-JAX f32 reference (SAGEConv semantics) for a sanity check
# ---------------------------------------------------------------------------
def _reference_forward(params, x, edge_index, num_nodes):
    src, dst = edge_index[0], edge_index[1]
    adj = jnp.zeros((num_nodes, num_nodes), jnp.float32).at[dst, src].add(1.0)
    deg = adj.sum(axis=1, keepdims=True)
    a = adj * jnp.where(deg > 0, 1.0 / deg, 0.0)
    h = a @ x @ params["w_l1"] + x @ params["w_r1"] + params["b1"]
    h = jnp.maximum(h, 0.0)
    return a @ h @ params["w_l2"] + h @ params["w_r2"] + params["b2"]


if __name__ == "__main__":
    key = jax.random.PRNGKey(0)
    k_x, k_e, k_p = jax.random.split(key, 3)

    num_nodes = 16
    in_channels, hidden_channels, out_channels = 8, 32, 8
    num_edges = 32

    # Node features [N, Cin] and a deterministic random directed graph [2, E]
    x = jax.random.normal(k_x, (num_nodes, in_channels), jnp.float32)
    edge_index = jax.random.randint(k_e, (2, num_edges), 0, num_nodes, jnp.int32)

    params = init_params(k_p, in_channels, hidden_channels, out_channels)

    # Precompute / pad once, reuse across forward passes.
    n_pad = _round_up(num_nodes, LANE)
    cin_p = _round_up(in_channels, LANE)
    a_mean = mean_adjacency(edge_index, num_nodes, n_pad)
    wl1, wr1, b1, wl2, wr2, b2 = prepare_params(
        params, in_channels, hidden_channels, out_channels)
    x_pad = _pad2(x, n_pad, cin_p).astype(jnp.bfloat16)

    out = graphsage_forward(
        a_mean, x_pad, wl1, wr1, b1, wl2, wr2, b2,
        num_nodes=num_nodes, out_channels=out_channels,
    )
    out = jax.block_until_ready(out)

    assert out.shape == (num_nodes, out_channels)
    assert bool(jnp.all(jnp.isfinite(out)))

    # Loose tolerance: kernel feeds the MXU in bf16 (f32 accumulation).
    ref = _reference_forward(params, x, edge_index, num_nodes)
    assert bool(jnp.allclose(out, ref, rtol=1e-1, atol=1e-1))

    print("KERNEL_OK")
</pallas_src>

<mosaic_0001>
module attributes {stable_mosaic.version = 11 : i64} {
  func.func @_graphsage_fused_kernel(%arg0: i32, %arg1: memref<128x128xbf16, #tpu.memory_space<vmem>>, %arg2: memref<128x128xbf16, #tpu.memory_space<vmem>>, %arg3: memref<128x128xbf16, #tpu.memory_space<vmem>>, %arg4: memref<128x128xbf16, #tpu.memory_space<vmem>>, %arg5: memref<1x128xf32, #tpu.memory_space<vmem>>, %arg6: memref<128x128xbf16, #tpu.memory_space<vmem>>, %arg7: memref<128x128xbf16, #tpu.memory_space<vmem>>, %arg8: memref<1x128xf32, #tpu.memory_space<vmem>>, %arg9: memref<128x128xf32, #tpu.memory_space<vmem>>) attributes {dimension_semantics = [#tpu.dimension_semantics<arbitrary>], iteration_bounds = array<i64: 1>, scalar_prefetch = 0 : i64, scratch_operands = 0 : i64, tpu.core_type = #tpu.core_type<tc>, window_params = [{pipeline_mode = #tpu.pipeline_mode<synchronous>, transform_indices = @transform_0, window_bounds = array<i64: 128, 128>}, {pipeline_mode = #tpu.pipeline_mode<synchronous>, transform_indices = @transform_1, window_bounds = array<i64: 128, 128>}, {pipeline_mode = #tpu.pipeline_mode<synchronous>, transform_indices = @transform_2, window_bounds = array<i64: 128, 128>}, {pipeline_mode = #tpu.pipeline_mode<synchronous>, transform_indices = @transform_3, window_bounds = array<i64: 128, 128>}, {pipeline_mode = #tpu.pipeline_mode<synchronous>, transform_indices = @transform_4, window_bounds = array<i64: 1, 128>}, {pipeline_mode = #tpu.pipeline_mode<synchronous>, transform_indices = @transform_5, window_bounds = array<i64: 128, 128>}, {pipeline_mode = #tpu.pipeline_mode<synchronous>, transform_indices = @transform_6, window_bounds = array<i64: 128, 128>}, {pipeline_mode = #tpu.pipeline_mode<synchronous>, transform_indices = @transform_7, window_bounds = array<i64: 1, 128>}, {pipeline_mode = #tpu.pipeline_mode<synchronous>, transform_indices = @transform_8, window_bounds = array<i64: 128, 128>}]} {
    %c0 = arith.constant 0 : index
    %c0_0 = arith.constant 0 : index
    %0 = vector.load %arg1[%c0, %c0_0] : memref<128x128xbf16, #tpu.memory_space<vmem>>, vector<128x128xbf16>
    %c0_1 = arith.constant 0 : index
    %c0_2 = arith.constant 0 : index
    %1 = vector.load %arg2[%c0_1, %c0_2] : memref<128x128xbf16, #tpu.memory_space<vmem>>, vector<128x128xbf16>
    %cst = arith.constant dense<0.000000e+00> : vector<128x128xf32>
    %2 = tpu.matmul %0, %1, %cst {dimension_numbers = #tpu.dot_dimension_numbers<[1], [0], [0], [1], [0, 0, 1, 1], [], []>} : vector<128x128xbf16>, vector<128x128xbf16>, vector<128x128xf32> -> vector<128x128xf32>
    %3 = arith.truncf %2 : vector<128x128xf32> to vector<128x128xbf16>
    %c0_3 = arith.constant 0 : index
    %c0_4 = arith.constant 0 : index
    %4 = vector.load %arg3[%c0_3, %c0_4] : memref<128x128xbf16, #tpu.memory_space<vmem>>, vector<128x128xbf16>
    %cst_5 = arith.constant dense<0.000000e+00> : vector<128x128xf32>
    %5 = tpu.matmul %3, %4, %cst_5 {dimension_numbers = #tpu.dot_dimension_numbers<[1], [0], [0], [1], [0, 0, 1, 1], [], []>} : vector<128x128xbf16>, vector<128x128xbf16>, vector<128x128xf32> -> vector<128x128xf32>
    %c0_6 = arith.constant 0 : index
    %c0_7 = arith.constant 0 : index
    %6 = vector.load %arg4[%c0_6, %c0_7] : memref<128x128xbf16, #tpu.memory_space<vmem>>, vector<128x128xbf16>
    %cst_8 = arith.constant dense<0.000000e+00> : vector<128x128xf32>
    %7 = tpu.matmul %1, %6, %cst_8 {dimension_numbers = #tpu.dot_dimension_numbers<[1], [0], [0], [1], [0, 0, 1, 1], [], []>} : vector<128x128xbf16>, vector<128x128xbf16>, vector<128x128xf32> -> vector<128x128xf32>
    %8 = arith.addf %5, %7 : vector<128x128xf32>
    %c0_9 = arith.constant 0 : index
    %c0_10 = arith.constant 0 : index
    %9 = vector.load %arg5[%c0_9, %c0_10] : memref<1x128xf32, #tpu.memory_space<vmem>>, vector<1x128xf32>
    %10 = vector.broadcast %9 : vector<1x128xf32> to vector<128x128xf32>
    %11 = arith.addf %8, %10 : vector<128x128xf32>
    %cst_11 = arith.constant 0.000000e+00 : f32
    %12 = vector.broadcast %cst_11 : f32 to vector<128x128xf32>
    %13 = arith.maximumf %11, %12 : vector<128x128xf32>
    %14 = arith.truncf %13 : vector<128x128xf32> to vector<128x128xbf16>
    %c0_12 = arith.constant 0 : index
    %c0_13 = arith.constant 0 : index
    %15 = vector.load %arg6[%c0_12, %c0_13] : memref<128x128xbf16, #tpu.memory_space<vmem>>, vector<128x128xbf16>
    %cst_14 = arith.constant dense<0.000000e+00> : vector<128x128xf32>
    %16 = tpu.matmul %14, %15, %cst_14 {dimension_numbers = #tpu.dot_dimension_numbers<[1], [0], [0], [1], [0, 0, 1, 1], [], []>} : vector<128x128xbf16>, vector<128x128xbf16>, vector<128x128xf32> -> vector<128x128xf32>
    %17 = arith.truncf %16 : vector<128x128xf32> to vector<128x128xbf16>
    %cst_15 = arith.constant dense<0.000000e+00> : vector<128x128xf32>
    %18 = tpu.matmul %0, %17, %cst_15 {dimension_numbers = #tpu.dot_dimension_numbers<[1], [0], [0], [1], [0, 0, 1, 1], [], []>} : vector<128x128xbf16>, vector<128x128xbf16>, vector<128x128xf32> -> vector<128x128xf32>
    %c0_16 = arith.constant 0 : index
    %c0_17 = arith.constant 0 : index
    %19 = vector.load %arg7[%c0_16, %c0_17] : memref<128x128xbf16, #tpu.memory_space<vmem>>, vector<128x128xbf16>
    %cst_18 = arith.constant dense<0.000000e+00> : vector<128x128xf32>
    %20 = tpu.matmul %14, %19, %cst_18 {dimension_numbers = #tpu.dot_dimension_numbers<[1], [0], [0], [1], [0, 0, 1, 1], [], []>} : vector<128x128xbf16>, vector<128x128xbf16>, vector<128x128xf32> -> vector<128x128xf32>
    %21 = arith.addf %18, %20 : vector<128x128xf32>
    %c0_19 = arith.constant 0 : index
    %c0_20 = arith.constant 0 : index
    %22 = vector.load %arg8[%c0_19, %c0_20] : memref<1x128xf32, #tpu.memory_space<vmem>>, vector<1x128xf32>
    %23 = vector.broadcast %22 : vector<1x128xf32> to vector<128x128xf32>
    %24 = arith.addf %21, %23 : vector<128x128xf32>
    %c0_21 = arith.constant 0 : index
    %c0_22 = arith.constant 0 : index
    %25 = vector.load %arg9[%c0_21, %c0_22] : memref<128x128xf32, #tpu.memory_space<vmem>>, vector<128x128xf32>
    tpu.vector_store %arg9[%c0_21, %c0_22], %24 {strides = array<i32>} : memref<128x128xf32, #tpu.memory_space<vmem>>, vector<128x128xf32>,
    return
  }
  func.func @transform_0(%arg0: i32) -> (i32, i32) {
    %c0_i32 = arith.constant 0 : i32
    %c0_i32_0 = arith.constant 0 : i32
    %c0_i32_1 = arith.constant 0 : i32
    return %c0_i32, %c0_i32_0 : i32, i32
  }
  func.func @transform_1(%arg0: i32) -> (i32, i32) {
    %c0_i32 = arith.constant 0 : i32
    %c0_i32_0 = arith.constant 0 : i32
    %c0_i32_1 = arith.constant 0 : i32
    return %c0_i32, %c0_i32_0 : i32, i32
  }
  func.func @transform_2(%arg0: i32) -> (i32, i32) {
    %c0_i32 = arith.constant 0 : i32
    %c0_i32_0 = arith.constant 0 : i32
    %c0_i32_1 = arith.constant 0 : i32
    return %c0_i32, %c0_i32_0 : i32, i32
  }
  func.func @transform_3(%arg0: i32) -> (i32, i32) {
    %c0_i32 = arith.constant 0 : i32
    %c0_i32_0 = arith.constant 0 : i32
    %c0_i32_1 = arith.constant 0 : i32
    return %c0_i32, %c0_i32_0 : i32, i32
  }
  func.func @transform_4(%arg0: i32) -> (i32, i32) {
    %c0_i32 = arith.constant 0 : i32
    %c0_i32_0 = arith.constant 0 : i32
    %c0_i32_1 = arith.constant 0 : i32
    return %c0_i32, %c0_i32_0 : i32, i32
  }
  func.func @transform_5(%arg0: i32) -> (i32, i32) {
    %c0_i32 = arith.constant 0 : i32
    %c0_i32_0 = arith.constant 0 : i32
    %c0_i32_1 = arith.constant 0 : i32
    return %c0_i32, %c0_i32_0 : i32, i32
  }
  func.func @transform_6(%arg0: i32) -> (i32, i32) {
    %c0_i32 = arith.constant 0 : i32
    %c0_i32_0 = arith.constant 0 : i32
    %c0_i32_1 = arith.constant 0 : i32
    return %c0_i32, %c0_i32_0 : i32, i32
  }
  func.func @transform_7(%arg0: i32) -> (i32, i32) {
    %c0_i32 = arith.constant 0 : i32
    %c0_i32_0 = arith.constant 0 : i32
    %c0_i32_1 = arith.constant 0 : i32
    return %c0_i32, %c0_i32_0 : i32, i32
  }
  func.func @transform_8(%arg0: i32) -> (i32, i32) {
    %c0_i32 = arith.constant 0 : i32
    %c0_i32_0 = arith.constant 0 : i32
    %c0_i32_1 = arith.constant 0 : i32
    return %c0_i32, %c0_i32_0 : i32, i32
  }
}

</mosaic_0001>

<bundles_post_ra>
// kernel: tpu_custom_call.1
= control target key start
LH: loop header
LB: loop body
LE: loop exit
PB: predicated region body
PF: predicated region fallthrough
CT: control target
= control target key end

     0   :  { %13 = vsyncpa [#allocation3], 0  ;;  %s2072_s0 = inlined_call_operand.hbm [shape: bf16[128,128], index: 0, kind: input, shape index: {}]   ;;  %s2073_s1 = inlined_call_operand.hbm [shape: bf16[128,128], index: 1, kind: input, shape index: {}]   ;;  %s2074_s2 = inlined_call_operand.hbm [shape: bf16[128,128], index: 2, kind: input, shape index: {}]   ;;  %s2075_s3 = inlined_call_operand.hbm [shape: bf16[128,128], index: 3, kind: input, shape index: {}]   ;;  %s2076_s4 = inlined_call_operand.vmem [shape: f32[1,128], index: 4, kind: input, shape index: {}]   ;;  %s2077_s5 = inlined_call_operand.hbm [shape: bf16[128,128], index: 5, kind: input, shape index: {}]   ;;  %s2078_s6 = inlined_call_operand.hbm [shape: bf16[128,128], index: 6, kind: input, shape index: {}]   ;;  %s2079_s7 = inlined_call_operand.vmem [shape: f32[1,128], index: 7, kind: input, shape index: {}]   ;;  %s2080_s8 = inlined_call_operand.hbm [shape: f32[128,128], index: 8, kind: output, shape index: {}]  }
   0x1   :  { %14 = vsyncpa [#allocation6], 0 }
   0x2   :  { %15 = vsyncpa [#allocation9], 0 }
   0x3   :  { %16 = vsyncpa [#allocation12], 0 }
   0x4   :  { %17 = vsyncpa [#allocation4], 0  ;;  %s1794_s27 = smov [#allocation5]   ;;  %s1795_s29 = smov [#allocation8]  }
   0x5   :  { %s35_s28 = sshll.u32 %s1794_s27, 4  ;;  %s59_s30 = sshll.u32 %s1795_s29, 4  ;;  %s36_s28 = int_to_ptr.vmem [resolvable:$true] %s35_s28  ;;  %s1850_s30 = int_to_ptr.vmem [resolvable:$true] %s59_s30 }
   0x6   :  { %s1630_s11 = scalar_lea.hbm %s2073_s1, 1024 }
   0x7   :  { %p1631_p0 = scmp.ne.s32.totalorder %s2073_s1, %s1630_s11  ;;  %p1634_p1 = scmp.lt.u32.totalorder %s1630_s11, %s2073_s1 }
   0x9   :  { %p1636_p2 = pnand %p1634_p1, %p1631_p0 }
   0xb   :  { %1639 = shalt.err (!%p1636_p2)
}
   0xc   :  { %s1640_s16 = scalar_lea.vmem %s36_s28, 1024  ;;  %p1645_p4 = scmp.lt.s32.totalorder %s36_s28, %s36_s28 }
   0xd   :  { %p1641_p3 = scmp.ne.s32.totalorder %s36_s28, %s1640_s16  ;;  %p1646_p5 = scmp.lt.s32.totalorder %s1640_s16, %s1640_s16 }
   0xf   :  { %p1647_p6 = por %p1646_p5, %p1645_p4 }
  0x11   :  { %p1648_p7 = pnand %p1647_p6, %p1641_p3 }
  0x13   :  { %1651 = shalt.err (!%p1648_p7)
}
  0x14   :  { %s1796_s17 = smov 64   ;;  %s1797_s18 = smov 4  }
  0x15   :  { %41 = dma.hbm_to_vmem [thread:$0]  %s2073_s1, 1024, %s36_s28, [#allocation6], %s1796_s17, %s1796_s17, %s1797_s18  }
  0x16   :  { %s1652_s23 = scalar_lea.hbm %s2075_s3, 1024 }
  0x17   :  { %p1653_p8 = scmp.ne.s32.totalorder %s2075_s3, %s1652_s23  ;;  %p1656_p9 = scmp.lt.u32.totalorder %s1652_s23, %s2075_s3 }
  0x19   :  { %p1658_p10 = pnand %p1656_p9, %p1653_p8 }
  0x1b   :  { %1661 = shalt.err (!%p1658_p10)
}
  0x1c   :  { %s1662_s29 = scalar_lea.vmem %s1850_s30, 1024  ;;  %p1667_p12 = scmp.lt.s32.totalorder %s1850_s30, %s1850_s30 }
  0x1d   :  { %p1663_p11 = scmp.ne.s32.totalorder %s1850_s30, %s1662_s29  ;;  %p1668_p13 = scmp.lt.s32.totalorder %s1662_s29, %s1662_s29 }
  0x1f   :  { %p1669_p0 = por %p1668_p13, %p1667_p12 }
  0x21   :  { %p1670_p1 = pnand %p1669_p0, %p1663_p11 }
  0x23   :  { %1673 = shalt.err (!%p1670_p1)
}
  0x24   :  { %65 = dma.hbm_to_vmem [thread:$0]  %s2075_s3, 1024, %s1850_s30, [#allocation9], %s1796_s17, %s1796_s17, %s1797_s18  }
  0x25   :  { %s1798_s9 = smov [#allocation2]   ;;  %s1799_s11 = smov [#allocation7]  }
  0x26   :  { %s23_s10 = sshll.u32 %s1798_s9, 4  ;;  %s47_s12 = sshll.u32 %s1799_s11, 4  ;;  %s24_s10 = int_to_ptr.vmem [resolvable:$true] %s23_s10  ;;  %s1887_s12 = int_to_ptr.vmem [resolvable:$true] %s47_s12 }
  0x27   :  { %s1674_s15 = scalar_lea.hbm %s2072_s0, 1024 }
  0x28   :  { %p1675_p2 = scmp.ne.s32.totalorder %s2072_s0, %s1674_s15  ;;  %p1678_p3 = scmp.lt.u32.totalorder %s1674_s15, %s2072_s0 }
  0x2a   :  { %p1680_p4 = pnand %p1678_p3, %p1675_p2 }
  0x2c   :  { %1683 = shalt.err (!%p1680_p4)
}
  0x2d   :  { %s1684_s3 = scalar_lea.vmem %s24_s10, 1024  ;;  %p1689_p6 = scmp.lt.s32.totalorder %s24_s10, %s24_s10 }
  0x2e   :  { %p1685_p5 = scmp.ne.s32.totalorder %s24_s10, %s1684_s3  ;;  %p1690_p7 = scmp.lt.s32.totalorder %s1684_s3, %s1684_s3 }
  0x30   :  { %p1691_p8 = por %p1690_p7, %p1689_p6 }
  0x32   :  { %p1692_p9 = pnand %p1691_p8, %p1685_p5 }
  0x34   :  { %1695 = shalt.err (!%p1692_p9)
}
  0x35   :  { %29 = dma.hbm_to_vmem [thread:$0]  %s2072_s0, 1024, %s24_s10, [#allocation3], %s1796_s17, %s1796_s17, %s1797_s18  }
  0x36   :  { %s1696_s25 = scalar_lea.hbm %s2074_s2, 1024 }
  0x37   :  { %p1697_p10 = scmp.ne.s32.totalorder %s2074_s2, %s1696_s25  ;;  %p1700_p11 = scmp.lt.u32.totalorder %s1696_s25, %s2074_s2 }
  0x39   :  { %p1702_p12 = pnand %p1700_p11, %p1697_p10 }
  0x3b   :  { %1705 = shalt.err (!%p1702_p12)
}
  0x3c   :  { %s1706_s28 = scalar_lea.vmem %s1887_s12, 1024  ;;  %p1711_p0 = scmp.lt.s32.totalorder %s1887_s12, %s1887_s12 }
  0x3d   :  { %p1707_p13 = scmp.ne.s32.totalorder %s1887_s12, %s1706_s28  ;;  %p1712_p1 = scmp.lt.s32.totalorder %s1706_s28, %s1706_s28 }
  0x3f   :  { %p1713_p2 = por %p1712_p1, %p1711_p0 }
  0x41   :  { %p1714_p3 = pnand %p1713_p2, %p1707_p13 }
  0x43   :  { %1717 = shalt.err (!%p1714_p3)
}
  0x44   :  { %53 = dma.hbm_to_vmem [thread:$0]  %s2074_s2, 1024, %s1887_s12, [#allocation6], %s1796_s17, %s1796_s17, %s1797_s18  }
  0x45   :  { %s1800_s10 = smov [#allocation10]   ;;  %s1801_s13 = smov [#allocation11]  }
  0x46   :  { %s73_s11 = sshll.u32 %s1800_s10, 4  ;;  %s85_s14 = sshll.u32 %s1801_s13, 4  ;;  %s74_s11 = int_to_ptr.vmem [resolvable:$true] %s73_s11  ;;  %s1924_s14 = int_to_ptr.vmem [resolvable:$true] %s85_s14 }
  0x47   :  { %s1718_s19 = scalar_lea.hbm %s2077_s5, 1024 }
  0x48   :  { %p1719_p4 = scmp.ne.s32.totalorder %s2077_s5, %s1718_s19  ;;  %p1722_p5 = scmp.lt.u32.totalorder %s1718_s19, %s2077_s5 }
  0x4a   :  { %p1724_p6 = pnand %p1722_p5, %p1719_p4 }
  0x4c   :  { %1727 = shalt.err (!%p1724_p6)
}
  0x4d   :  { %s1728_s2 = scalar_lea.vmem %s74_s11, 1024  ;;  %p1733_p8 = scmp.lt.s32.totalorder %s74_s11, %s74_s11 }
  0x4e   :  { %p1729_p7 = scmp.ne.s32.totalorder %s74_s11, %s1728_s2  ;;  %p1734_p9 = scmp.lt.s32.totalorder %s1728_s2, %s1728_s2 }
  0x50   :  { %p1735_p10 = por %p1734_p9, %p1733_p8 }
  0x52   :  { %p1736_p11 = pnand %p1735_p10, %p1729_p7 }
  0x54   :  { %1739 = shalt.err (!%p1736_p11)
}
  0x55   :  { %79 = dma.hbm_to_vmem [thread:$0]  %s2077_s5, 1024, %s74_s11, [#allocation9], %s1796_s17, %s1796_s17, %s1797_s18  }
  0x56   :  { %s1740_s25 = scalar_lea.hbm %s2078_s6, 1024 }
  0x57   :  { %p1741_p12 = scmp.ne.s32.totalorder %s2078_s6, %s1740_s25  ;;  %p1744_p13 = scmp.lt.u32.totalorder %s1740_s25, %s2078_s6 }
  0x59   :  { %p1746_p0 = pnand %p1744_p13, %p1741_p12 }
  0x5b   :  { %1749 = shalt.err (!%p1746_p0)
}
  0x5c   :  { %s1750_s28 = scalar_lea.vmem %s1924_s14, 1024  ;;  %p1755_p2 = scmp.lt.s32.totalorder %s1924_s14, %s1924_s14 }
  0x5d   :  { %p1751_p1 = scmp.ne.s32.totalorder %s1924_s14, %s1750_s28  ;;  %p1756_p3 = scmp.lt.s32.totalorder %s1750_s28, %s1750_s28 }
  0x5f   :  { %p1757_p4 = por %p1756_p3, %p1755_p2 }
  0x61   :  { %p1758_p5 = pnand %p1757_p4, %p1751_p1 }
  0x63   :  { %1761 = shalt.err (!%p1758_p5)
}
  0x64   :  { %91 = dma.hbm_to_vmem [thread:$0]  %s2078_s6, 1024, %s1924_s14, [#allocation12], %s1796_s17, %s1796_s17, %s1797_s18  }
  0x65   :  { %1784 = dma.done.wait [#allocation3], 1024  }
  0x66   :  { %1785 = vsyncadd [#allocation3], 4294966272 }
  0x67   :  { %1786 = dma.done.wait [#allocation6], 2048  }
  0x68   :  { %1787 = vsyncadd [#allocation6], 4294965248 }
  0x69   :  { %1788 = dma.done.wait [#allocation9], 2048  }
  0x6a   :  { %1789 = vsyncadd [#allocation9], 4294965248 }
  0x6b   :  { %1790 = dma.done.wait [#allocation12], 1024  }
  0x6c   :  { %1791 = vsyncadd [#allocation12], 4294966272  ;;  %v1582_v0 = vld [vmem:[#allocation5] sm:$0xff]   ;;  %v1961_v1 = vld [vmem:[#allocation5 + $0x8] sm:$0xff]  }
  0x6d   :  { %1347 = vmatprep.subr.bf16.mxu1 %v1582_v0  ;;  %v1964_v2 = vld [vmem:[#allocation5 + $0x10] sm:$0xff]   ;;  %v1967_v3 = vld [vmem:[#allocation5 + $0x18] sm:$0xff]   ;;  %v1970_v4 = vld [vmem:[#allocation2] sm:$0xff]  }
  0x6e   :  { %1348 = vmatpush3.bf16.msra.mxu1 %v1582_v0  ;;  %1363 = vmatprep.mubr.bf16.mxu1 %v1970_v4  ;;  %v1975_v5 = vld [vmem:[#allocation5 + $0x20] sm:$0xff]   ;;  %v1979_v6 = vld [vmem:[#allocation5 + $0x28] sm:$0xff]   ;;  %v1983_v7 = vld [vmem:[#allocation5 + $0x30] sm:$0xff]  }
  0x6f   :  { %1349 = vmatprep.subr.bf16.mxu1 %v1961_v1  ;;  %v1987_v8 = vld [vmem:[#allocation5 + $0x38] sm:$0xff]   ;;  %v1991_v9 = vld [vmem:[#allocation2 + $0x8] sm:$0xff]   ;;  %v1598_v10 = vld [vmem:[#allocation8] sm:$0xff]  }
  0x70   :  { %v1993_v11 = vld [vmem:[#allocation2 + $0x10] sm:$0xff]   ;;  %v1599_v12 = vld [vmem:[#allocation8 + $0x8] sm:$0xff]   ;;  %v1998_v14 = vld [vmem:[#allocation2 + $0x18] sm:$0xff]  }
  0x71   :  { %v1600_v13 = vld [vmem:[#allocation8 + $0x10] sm:$0xff]   ;;  %v2000_v15 = vld [vmem:[#allocation2 + $0x20] sm:$0xff]   ;;  %v1601_v16 = vld [vmem:[#allocation8 + $0x18] sm:$0xff]  }
  0x72   :  { %1350 = vmatpush3.bf16.msra.mxu1 %v1961_v1  ;;  %v1602_v17 = vld [vmem:[#allocation8 + $0x20] sm:$0xff]   ;;  %v2004_v18 = vld [vmem:[#allocation2 + $0x28] sm:$0xff]   ;;  %v2006_v19 = vld [vmem:[#allocation2 + $0x30] sm:$0xff]  }
  0x73   :  { %1351 = vmatprep.subr.bf16.mxu1 %v1964_v2  ;;  %v1603_v20 = vld [vmem:[#allocation8 + $0x28] sm:$0xff]   ;;  %v1604_v21 = vld [vmem:[#allocation8 + $0x30] sm:$0xff]   ;;  %v2010_v22 = vld [vmem:[#allocation2 + $0x38] sm:$0xff]  }
  0x74   :  { %v1605_v23 = vld [vmem:[#allocation8 + $0x38] sm:$0xff]   ;;  %v1606_v24 = vld [vmem:[#allocation7] sm:$0xff]   ;;  %v1607_v25 = vld [vmem:[#allocation7 + $0x8] sm:$0xff]  }
  0x75   :  { %v1608_v26 = vld [vmem:[#allocation7 + $0x10] sm:$0xff]   ;;  %v1609_v27 = vld [vmem:[#allocation7 + $0x18] sm:$0xff]   ;;  %v1610_v28 = vld [vmem:[#allocation7 + $0x20] sm:$0xff]  }
  0x76   :  { %1352 = vmatpush3.bf16.msra.mxu1 %v1964_v2  ;;  %v1611_v29 = vld [vmem:[#allocation7 + $0x28] sm:$0xff]   ;;  %v1612_v30 = vld [vmem:[#allocation7 + $0x30] sm:$0xff]   ;;  %v1613_v31 = vld [vmem:[#allocation7 + $0x38] sm:$0xff]  }
  0x77   :  { %1353 = vmatprep.subr.bf16.mxu1 %v1967_v3  ;;  %v1614_v32 = vld [vmem:[#allocation10] sm:$0xff]   ;;  %v1615_v33 = vld [vmem:[#allocation10 + $0x8] sm:$0xff]   ;;  %v1616_v34 = vld [vmem:[#allocation10 + $0x10] sm:$0xff]  }
  0x78   :  { %1443 = vmatprep.subr.bf16.mxu0 %v1614_v32  ;;  %v1617_v35 = vld [vmem:[#allocation10 + $0x18] sm:$0xff]   ;;  %v1618_v36 = vld [vmem:[#allocation10 + $0x20] sm:$0xff]   ;;  %v1619_v37 = vld [vmem:[#allocation10 + $0x28] sm:$0xff]  }
  0x79   :  { %1444 = vmatpush3.bf16.msra.mxu0 %v1614_v32  ;;  %v1620_v62 = vld [vmem:[#allocation10 + $0x30] sm:$0xff]   ;;  %v1621_v63 = vld [vmem:[#allocation10 + $0x38] sm:$0xff]  }
  0x7a   :  { %1354 = vmatpush3.bf16.msra.mxu1 %v1967_v3  ;;  %1445 = vmatprep.subr.bf16.mxu0 %v1615_v33 }
  0x7b   :  { %1355 = vmatprep.subr.bf16.mxu1 %v1975_v5 }
  0x7d   :  { %1446 = vmatpush3.bf16.msra.mxu0 %v1615_v33 }
  0x7e   :  { %1356 = vmatpush3.bf16.msra.mxu1 %v1975_v5  ;;  %1447 = vmatprep.subr.bf16.mxu0 %v1616_v34 }
  0x7f   :  { %1357 = vmatprep.subr.bf16.mxu1 %v1979_v6 }
  0x81   :  { %1448 = vmatpush3.bf16.msra.mxu0 %v1616_v34 }
  0x82   :  { %1358 = vmatpush3.bf16.msra.mxu1 %v1979_v6  ;;  %1449 = vmatprep.subr.bf16.mxu0 %v1617_v35 }
  0x83   :  { %1359 = vmatprep.subr.bf16.mxu1 %v1983_v7 }
  0x85   :  { %1450 = vmatpush3.bf16.msra.mxu0 %v1617_v35  ;;  %v1624_v35 = vld [vmem:[#allocation11 + $0x10] sm:$0xff]  }
  0x86   :  { %1360 = vmatpush3.bf16.msra.mxu1 %v1983_v7  ;;  %1451 = vmatprep.subr.bf16.mxu0 %v1618_v36 }
  0x87   :  { %1361 = vmatprep.subr.bf16.mxu1 %v1987_v8 }
  0x89   :  { %1452 = vmatpush3.bf16.msra.mxu0 %v1618_v36 }
  0x8a   :  { %1362 = vmatpush3.bf16.msra.mxu1 %v1987_v8  ;;  %1453 = vmatprep.subr.bf16.mxu0 %v1619_v37 }
  0x8b   :  { %1379 = vmatprep.subr.bf16.mxu1 %v1598_v10 }
  0x8d   :  { %1364 = vmatmul.mubr.bf16.vlgmr.msra.gmra.mrb[0].mxu1 %v1991_v9  ;;  %1454 = vmatpush3.bf16.msra.mxu0 %v1619_v37 }
  0x8e   :  { %1367 = vmatprep.mubr.bf16.mxu1 %v1993_v11  ;;  %1380 = vmatpush3.bf16.msra.mxu1 %v1598_v10 }
  0x8f   :  { %1381 = vmatprep.subr.bf16.mxu1 %v1599_v12  ;;  %1455 = vmatprep.subr.bf16.mxu0 %v1620_v62 }
  0x91   :  { %1456 = vmatpush3.bf16.msra.mxu0 %v1620_v62 }
  0x92   :  { %1382 = vmatpush3.bf16.msra.mxu1 %v1599_v12  ;;  %1457 = vmatprep.subr.bf16.mxu0 %v1621_v63 }
  0x93   :  { %1383 = vmatprep.subr.bf16.mxu1 %v1600_v13 }
  0x95   :  { %1368 = vmatmul.mubr.bf16.gmra.mrb[4].mxu1 %v1998_v14  ;;  %1458 = vmatpush3.bf16.msra.mxu0 %v1621_v63 }
  0x96   :  { %1371 = vmatprep.mubr.bf16.mxu1 %v2000_v15  ;;  %1384 = vmatpush3.bf16.msra.mxu1 %v1600_v13 }
  0x97   :  { %1385 = vmatprep.subr.bf16.mxu1 %v1601_v16 }
  0x9a   :  { %1386 = vmatpush3.bf16.msra.mxu1 %v1601_v16 }
  0x9b   :  { %1387 = vmatprep.subr.bf16.mxu1 %v1602_v17 }
  0x9d   :  { %1372 = vmatmul.mubr.bf16.gmra.mrb[8].mxu1 %v2004_v18 }
  0x9e   :  { %1375 = vmatprep.mubr.bf16.mxu1 %v2006_v19  ;;  %1388 = vmatpush3.bf16.msra.mxu1 %v1602_v17 }
  0x9f   :  { %1389 = vmatprep.subr.bf16.mxu1 %v1603_v20 }
  0xa2   :  { %1390 = vmatpush3.bf16.msra.mxu1 %v1603_v20 }
  0xa3   :  { %1391 = vmatprep.subr.bf16.mxu1 %v1604_v21 }
  0xa5   :  { %1376 = vmatmul.mubr.bf16.gmra.mrb[12].mxu1 %v2010_v22 }
  0xa6   :  { %1392 = vmatpush3.bf16.msra.mxu1 %v1604_v21  ;;  %1395 = vmatprep.mubr.bf16.mxu1 %v1582_v0  ;;  %v1622_v0 = vld [vmem:[#allocation11] sm:$0xff]  }
  0xa7   :  { %1393 = vmatprep.subr.bf16.mxu1 %v1605_v23  ;;  %1475 = vmatprep.subr.bf16.mxu0 %v1622_v0 }
  0xaa   :  { %1394 = vmatpush3.bf16.msra.mxu1 %v1605_v23 }
  0xab   :  { %1411 = vmatprep.subr.bf16.mxu1 %v1606_v24 }
  0xad   :  { %1396 = vmatmul.mubr.bf16.vlgmr.msra.gmra.mrb[16].mxu1 %v1961_v1  ;;  %v2023_v1 = vld [vmem:[%s2076_s4] ss:$0 sm:$0xff] }
  0xae   :  { %1412 = vmatpush3.bf16.msra.mxu1 %v1606_v24  ;;  %1399 = vmatprep.mubr.bf16.mxu1 %v1964_v2 }
  0xaf   :  { %1413 = vmatprep.subr.bf16.mxu1 %v1607_v25 }
  0xb2   :  { %1414 = vmatpush3.bf16.msra.mxu1 %v1607_v25 }
  0xb3   :  { %1415 = vmatprep.subr.bf16.mxu1 %v1608_v26 }
  0xb5   :  { %1400 = vmatmul.mubr.bf16.gmra.mrb[20].mxu1 %v1967_v3 }
  0xb6   :  { %1416 = vmatpush3.bf16.msra.mxu1 %v1608_v26  ;;  %1403 = vmatprep.mubr.bf16.mxu1 %v1975_v5 }
  0xb7   :  { %1417 = vmatprep.subr.bf16.mxu1 %v1609_v27 }
  0xba   :  { %1418 = vmatpush3.bf16.msra.mxu1 %v1609_v27  ;;  %v1623_v27 = vld [vmem:[#allocation11 + $0x8] sm:$0xff]  }
  0xbb   :  { %1419 = vmatprep.subr.bf16.mxu1 %v1610_v28 }
  0xbd   :  { %1404 = vmatmul.mubr.bf16.gmra.mrb[24].mxu1 %v1979_v6 }
  0xbe   :  { %1420 = vmatpush3.bf16.msra.mxu1 %v1610_v28  ;;  %1407 = vmatprep.mubr.bf16.mxu1 %v1983_v7 }
  0xbf   :  { %1421 = vmatprep.subr.bf16.mxu1 %v1611_v29 }
  0xc2   :  { %1422 = vmatpush3.bf16.msra.mxu1 %v1611_v29 }
  0xc3   :  { %1423 = vmatprep.subr.bf16.mxu1 %v1612_v30 }
  0xc5   :  { %1408 = vmatmul.mubr.bf16.gmra.mrb[28].mxu1 %v1987_v8 }
  0xc6   :  { %1424 = vmatpush3.bf16.msra.mxu1 %v1612_v30 }
  0xc7   :  { %1425 = vmatprep.subr.bf16.mxu1 %v1613_v31 }
  0xca   :  { %1426 = vmatpush3.bf16.msra.mxu1 %v1613_v31 }
 0x160   :  { %v1365_v38 = vpop.f32.mrb[0].mxu1 }
 0x161   :  { %v275_v39 = vpop.f32.mrb[1].mxu1 }
 0x162   :  { %v1366_v40 = vpop.f32.mrb[2].mxu1 }
 0x163   :  { %v339_v41 = vpack.c.bf16 %v1366_v40, %v1365_v38  ;;  %v278_v42 = vpop.f32.mrb[3].mxu1 }
 0x164   :  { %v338_v43 = vpack.c.bf16 %v278_v42, %v275_v39 }
 0x166   :  { %1427 = vmatprep.mubr.bf16.mxu1 %v338_v43  ;;  %v1625_v43 = vld [vmem:[#allocation11 + $0x18] sm:$0xff]  }
 0x167   :  { %1428 = vmatmul.mubr.bf16.vlgmr.msra.gmra.mrb[16].mxu1 %v339_v41 }
 0x168   :  { %v1369_v44 = vpop.f32.mrb[4].mxu1 }
 0x169   :  { %v291_v45 = vpop.f32.mrb[5].mxu1 }
 0x16a   :  { %v1370_v46 = vpop.f32.mrb[6].mxu1 }
 0x16b   :  { %v341_v47 = vpack.c.bf16 %v1370_v46, %v1369_v44  ;;  %v294_v48 = vpop.f32.mrb[7].mxu1 }
 0x16c   :  { %v340_v49 = vpack.c.bf16 %v294_v48, %v291_v45 }
 0x16e   :  { %1431 = vmatprep.mubr.bf16.mxu1 %v340_v49 }
 0x16f   :  { %1432 = vmatmul.mubr.bf16.gmra.mrb[20].mxu1 %v341_v47 }
 0x170   :  { %v1373_v50 = vpop.f32.mrb[8].mxu1 }
 0x171   :  { %v307_v51 = vpop.f32.mrb[9].mxu1 }
 0x172   :  { %v1374_v52 = vpop.f32.mrb[10].mxu1 }
 0x173   :  { %v343_v53 = vpack.c.bf16 %v1374_v52, %v1373_v50  ;;  %v310_v54 = vpop.f32.mrb[11].mxu1 }
 0x174   :  { %v342_v55 = vpack.c.bf16 %v310_v54, %v307_v51  ;;  %v1626_v51 = vld [vmem:[#allocation11 + $0x20] sm:$0xff]  }
 0x176   :  { %1435 = vmatprep.mubr.bf16.mxu1 %v342_v55 }
 0x177   :  { %1436 = vmatmul.mubr.bf16.gmra.mrb[24].mxu1 %v343_v53 }
 0x178   :  { %v1377_v56 = vpop.f32.mrb[12].mxu1 }
 0x179   :  { %v323_v57 = vpop.f32.mrb[13].mxu1 }
 0x17a   :  { %v1378_v58 = vpop.f32.mrb[14].mxu1 }
 0x17b   :  { %v345_v59 = vpack.c.bf16 %v1378_v58, %v1377_v56  ;;  %v326_v60 = vpop.f32.mrb[15].mxu1 }
 0x17c   :  { %v344_v61 = vpack.c.bf16 %v326_v60, %v323_v57 }
 0x17e   :  { %1439 = vmatprep.mubr.bf16.mxu1 %v344_v61 }
 0x17f   :  { %1440 = vmatmul.mubr.bf16.gmra.mrb[28].mxu1 %v345_v59  ;;  %v1627_v59 = vld [vmem:[#allocation11 + $0x28] sm:$0xff]  }
 0x23a   :  { %v1429_v2 = vpop.f32.mrb[16].mxu1 }
 0x23b   :  { %v677_v3 = vadd.f32 %v1429_v2, %v2023_v1  ;;  %v605_v5 = vpop.f32.mrb[17].mxu1 }
 0x23c   :  { %v675_v6 = vadd.f32 %v2023_v1, %v605_v5  ;;  %v1430_v7 = vpop.f32.mrb[18].mxu1  ;;  %v1628_v5 = vld [vmem:[#allocation11 + $0x30] sm:$0xff]  }
 0x23d   :  { %v678_v8 = vadd.f32 %v1430_v7, %v2023_v1  ;;  %v608_v10 = vpop.f32.mrb[19].mxu1  ;;  %v693_v13 = vmax.f32 %v677_v3, 0.0 }
 0x23e   :  { %v676_v12 = vadd.f32 %v2023_v1, %v608_v10  ;;  %v691_v17 = vmax.f32 %v675_v6, 0.0 }
 0x23f   :  { %v694_v16 = vmax.f32 %v678_v8, 0.0 }
 0x240   :  { %v692_v20 = vmax.f32 %v676_v12, 0.0  ;;  %v1629_v12 = vld [vmem:[#allocation11 + $0x38] sm:$0xff]  }
 0x241   :  { %v2029_v21 = vpack.c.bf16 %v694_v16, %v693_v13 }
 0x242   :  { %v1433_v23 = vpop.f32.mrb[20].mxu1  ;;  %v2031_v24 = vpack.c.bf16 %v692_v20, %v691_v17 }
 0x243   :  { %v681_v25 = vadd.f32 %v1433_v23, %v2023_v1  ;;  %v621_v26 = vpop.f32.mrb[21].mxu1 }
 0x244   :  { %v679_v28 = vadd.f32 %v2023_v1, %v621_v26  ;;  %v1434_v29 = vpop.f32.mrb[22].mxu1  ;;  %1459 = vmatprep.mubr.bf16.mxu0 %v2031_v24 }
 0x245   :  { %v682_v30 = vadd.f32 %v1434_v29, %v2023_v1  ;;  %v624_v31 = vpop.f32.mrb[23].mxu1  ;;  %1460 = vmatmul.mubr.bf16.vlgmr.msra.gmra.mrb[0].mxu0 %v2029_v21  ;;  %v697_v33 = vmax.f32 %v681_v25, 0.0 }
 0x246   :  { %v680_v32 = vadd.f32 %v2023_v1, %v624_v31  ;;  %1476 = vmatpush3.bf16.msra.mxu0 %v1622_v0  ;;  %v695_v36 = vmax.f32 %v679_v28, 0.0 }
 0x247   :  { %v698_v34 = vmax.f32 %v682_v30, 0.0  ;;  %1477 = vmatprep.subr.bf16.mxu0 %v1623_v27 }
 0x248   :  { %v696_v37 = vmax.f32 %v680_v32, 0.0 }
 0x249   :  { %v710_v38 = vpack.c.bf16 %v698_v34, %v697_v33 }
 0x24a   :  { %v709_v39 = vpack.c.bf16 %v696_v37, %v695_v36  ;;  %v1437_v40 = vpop.f32.mrb[24].mxu1  ;;  %1478 = vmatpush3.bf16.msra.mxu0 %v1623_v27 }
 0x24b   :  { %v685_v41 = vadd.f32 %v1437_v40, %v2023_v1  ;;  %v637_v42 = vpop.f32.mrb[25].mxu1  ;;  %1479 = vmatprep.subr.bf16.mxu0 %v1624_v35  ;;  %v1250_v40 = vld [vmem:[%s2079_s7] ss:$0 sm:$0xff]  ;;  %s1802_s7 = smov [#allocation13]  }
 0x24c   :  { %v683_v44 = vadd.f32 %v2023_v1, %v637_v42  ;;  %v1438_v45 = vpop.f32.mrb[26].mxu1  ;;  %1463 = vmatprep.mubr.bf16.mxu0 %v709_v39  ;;  %s1186_s9 = sshll.u32 %s1802_s7, 4  ;;  %s1187_s9 = int_to_ptr.vmem [resolvable:$true] %s1186_s9 }
 0x24d   :  { %v686_v46 = vadd.f32 %v1438_v45, %v2023_v1  ;;  %v640_v47 = vpop.f32.mrb[27].mxu1  ;;  %1464 = vmatmul.mubr.bf16.gmra.mrb[4].mxu0 %v710_v38  ;;  %v701_v49 = vmax.f32 %v685_v41, 0.0  ;;  %s1762_s10 = scalar_lea.vmem %s1187_s9, 2048  ;;  %p1767_p7 = scmp.lt.s32.totalorder %s1187_s9, %s1187_s9 }
 0x24e   :  { %v684_v48 = vadd.f32 %v2023_v1, %v640_v47  ;;  %1480 = vmatpush3.bf16.msra.mxu0 %v1624_v35  ;;  %v699_v52 = vmax.f32 %v683_v44, 0.0  ;;  %p1763_p6 = scmp.ne.s32.totalorder %s1187_s9, %s1762_s10  ;;  %p1768_p8 = scmp.lt.s32.totalorder %s1762_s10, %s1762_s10 }
 0x24f   :  { %v702_v50 = vmax.f32 %v686_v46, 0.0  ;;  %1481 = vmatprep.subr.bf16.mxu0 %v1625_v43 }
 0x250   :  { %v700_v53 = vmax.f32 %v684_v48, 0.0  ;;  %p1769_p9 = por %p1768_p8, %p1767_p7 }
 0x251   :  { %v712_v54 = vpack.c.bf16 %v702_v50, %v701_v49 }
 0x252   :  { %v711_v55 = vpack.c.bf16 %v700_v53, %v699_v52  ;;  %v1441_v56 = vpop.f32.mrb[28].mxu1  ;;  %1482 = vmatpush3.bf16.msra.mxu0 %v1625_v43  ;;  %p1770_p10 = pnand %p1769_p9, %p1763_p6 }
 0x253   :  { %v689_v57 = vadd.f32 %v1441_v56, %v2023_v1  ;;  %v653_v58 = vpop.f32.mrb[29].mxu1  ;;  %1483 = vmatprep.subr.bf16.mxu0 %v1626_v51 }
 0x254   :  { %v687_v60 = vadd.f32 %v2023_v1, %v653_v58  ;;  %v1442_v61 = vpop.f32.mrb[30].mxu1  ;;  %1467 = vmatprep.mubr.bf16.mxu0 %v711_v55 }
 0x255   :  { %v690_v62 = vadd.f32 %v1442_v61, %v2023_v1  ;;  %v656_v63 = vpop.f32.mrb[31].mxu1  ;;  %1468 = vmatmul.mubr.bf16.gmra.mrb[8].mxu0 %v712_v54  ;;  %v705_v2 = vmax.f32 %v689_v57, 0.0 }
 0x256   :  { %v688_v0 = vadd.f32 %v2023_v1, %v656_v63  ;;  %1484 = vmatpush3.bf16.msra.mxu0 %v1626_v51  ;;  %v703_v6 = vmax.f32 %v687_v60, 0.0 }
 0x257   :  { %v706_v3 = vmax.f32 %v690_v62, 0.0  ;;  %1485 = vmatprep.subr.bf16.mxu0 %v1627_v59 }
 0x258   :  { %v704_v7 = vmax.f32 %v688_v0, 0.0 }
 0x259   :  { %v714_v8 = vpack.c.bf16 %v706_v3, %v705_v2 }
 0x25a   :  { %v713_v10 = vpack.c.bf16 %v704_v7, %v703_v6  ;;  %1486 = vmatpush3.bf16.msra.mxu0 %v1627_v59 }
 0x25b   :  { %1487 = vmatprep.subr.bf16.mxu0 %v1628_v5 }
 0x25c   :  { %1471 = vmatprep.mubr.bf16.mxu0 %v713_v10 }
 0x25d   :  { %1472 = vmatmul.mubr.bf16.gmra.mrb[12].mxu0 %v714_v8 }
 0x25e   :  { %1488 = vmatpush3.bf16.msra.mxu0 %v1628_v5  ;;  %1491 = vmatprep.mubr.bf16.mxu0 %v2031_v24 }
 0x25f   :  { %1489 = vmatprep.subr.bf16.mxu0 %v1629_v12 }
 0x262   :  { %1490 = vmatpush3.bf16.msra.mxu0 %v1629_v12 }
 0x265   :  { %1492 = vmatmul.mubr.bf16.vlgmr.msra.gmra.mrb[16].mxu0 %v2029_v21 }
 0x266   :  { %1495 = vmatprep.mubr.bf16.mxu0 %v709_v39 }
 0x26d   :  { %1496 = vmatmul.mubr.bf16.gmra.mrb[20].mxu0 %v710_v38 }
 0x26e   :  { %1499 = vmatprep.mubr.bf16.mxu0 %v711_v55 }
 0x275   :  { %1500 = vmatmul.mubr.bf16.gmra.mrb[24].mxu0 %v712_v54 }
 0x276   :  { %1503 = vmatprep.mubr.bf16.mxu0 %v713_v10 }
 0x27d   :  { %1504 = vmatmul.mubr.bf16.gmra.mrb[28].mxu0 %v714_v8 }
 0x27e   :  { %1523 = vmatprep.mubr.bf16.mxu0 %v1970_v4 }
 0x318   :  { %v1461_v1 = vpop.f32.mrb[0].mxu0 }
 0x319   :  { %v813_v13 = vpop.f32.mrb[1].mxu0 }
 0x31a   :  { %v1462_v16 = vpop.f32.mrb[2].mxu0 }
 0x31b   :  { %v877_v17 = vpack.c.bf16 %v1462_v16, %v1461_v1  ;;  %v816_v20 = vpop.f32.mrb[3].mxu0 }
 0x31c   :  { %v876_v23 = vpack.c.bf16 %v816_v20, %v813_v13 }
 0x31e   :  { %1507 = vmatprep.subr.bf16.mxu0 %v876_v23 }
 0x31f   :  { %1508 = vmatpush3.bf16.msra.mxu0 %v876_v23 }
 0x320   :  { %v1465_v24 = vpop.f32.mrb[4].mxu0  ;;  %1509 = vmatprep.subr.bf16.mxu0 %v877_v17 }
 0x321   :  { %v829_v25 = vpop.f32.mrb[5].mxu0 }
 0x322   :  { %v1466_v21 = vpop.f32.mrb[6].mxu0 }
 0x323   :  { %v879_v26 = vpack.c.bf16 %v1466_v21, %v1465_v24  ;;  %v832_v27 = vpop.f32.mrb[7].mxu0  ;;  %1510 = vmatpush3.bf16.msra.mxu0 %v877_v17 }
 0x324   :  { %v878_v28 = vpack.c.bf16 %v832_v27, %v829_v25 }
 0x326   :  { %1511 = vmatprep.subr.bf16.mxu0 %v878_v28 }
 0x327   :  { %1512 = vmatpush3.bf16.msra.mxu0 %v878_v28 }
 0x328   :  { %v1469_v29 = vpop.f32.mrb[8].mxu0  ;;  %1513 = vmatprep.subr.bf16.mxu0 %v879_v26 }
 0x329   :  { %v845_v4 = vpop.f32.mrb[9].mxu0 }
 0x32a   :  { %v1470_v30 = vpop.f32.mrb[10].mxu0 }
 0x32b   :  { %v881_v31 = vpack.c.bf16 %v1470_v30, %v1469_v29  ;;  %v848_v32 = vpop.f32.mrb[11].mxu0  ;;  %1514 = vmatpush3.bf16.msra.mxu0 %v879_v26 }
 0x32c   :  { %v880_v33 = vpack.c.bf16 %v848_v32, %v845_v4 }
 0x32e   :  { %1515 = vmatprep.subr.bf16.mxu0 %v880_v33 }
 0x32f   :  { %1516 = vmatpush3.bf16.msra.mxu0 %v880_v33 }
 0x330   :  { %v1473_v34 = vpop.f32.mrb[12].mxu0  ;;  %1517 = vmatprep.subr.bf16.mxu0 %v881_v31 }
 0x331   :  { %v861_v35 = vpop.f32.mrb[13].mxu0 }
 0x332   :  { %v1474_v36 = vpop.f32.mrb[14].mxu0 }
 0x333   :  { %v883_v37 = vpack.c.bf16 %v1474_v36, %v1473_v34  ;;  %v864_v38 = vpop.f32.mrb[15].mxu0  ;;  %1518 = vmatpush3.bf16.msra.mxu0 %v881_v31 }
 0x334   :  { %v882_v39 = vpack.c.bf16 %v864_v38, %v861_v35 }
 0x336   :  { %1519 = vmatprep.subr.bf16.mxu0 %v882_v39 }
 0x337   :  { %1520 = vmatpush3.bf16.msra.mxu0 %v882_v39 }
 0x338   :  { %1521 = vmatprep.subr.bf16.mxu0 %v883_v37 }
 0x33b   :  { %1522 = vmatpush3.bf16.msra.mxu0 %v883_v37 }
 0x33e   :  { %1524 = vmatmul.mubr.bf16.vlgmr.msra.gmra.mrb[16].mxu0 %v1991_v9 }
 0x33f   :  { %1527 = vmatprep.mubr.bf16.mxu0 %v1993_v11 }
 0x346   :  { %1528 = vmatmul.mubr.bf16.gmra.mrb[20].mxu0 %v1998_v14 }
 0x347   :  { %1531 = vmatprep.mubr.bf16.mxu0 %v2000_v15 }
 0x34e   :  { %1532 = vmatmul.mubr.bf16.gmra.mrb[24].mxu0 %v2004_v18 }
 0x34f   :  { %1535 = vmatprep.mubr.bf16.mxu0 %v2006_v19 }
 0x356   :  { %1536 = vmatmul.mubr.bf16.gmra.mrb[28].mxu0 %v2010_v22 }
 0x411   :  { %v1525_v41 = vpop.f32.mrb[16].mxu0 }
 0x412   :  { %v1151_v42 = vadd.f32 %v1525_v41, %v1250_v40  ;;  %v1079_v43 = vpop.f32.mrb[17].mxu0 }
 0x413   :  { %v1149_v9 = vadd.f32 %v1250_v40, %v1079_v43  ;;  %v1526_v44 = vpop.f32.mrb[18].mxu0 }
 0x414   :  { %1167 = vst [vmem:[#allocation13 + $0x10] sm:$0xff] %v1151_v42  ;;  %v1152_v11 = vadd.f32 %v1526_v44, %v1250_v40  ;;  %v1082_v14 = vpop.f32.mrb[19].mxu0 }
 0x415   :  { %1165 = vst [vmem:[#allocation13] sm:$0xff] %v1149_v9  ;;  %v1150_v15 = vadd.f32 %v1250_v40, %v1082_v14 }
 0x416   :  { %1168 = vst [vmem:[#allocation13 + $0x18] sm:$0xff] %v1152_v11 }
 0x417   :  { %1166 = vst [vmem:[#allocation13 + $0x8] sm:$0xff] %v1150_v15 }
 0x419   :  { %v1529_v18 = vpop.f32.mrb[20].mxu0 }
 0x41a   :  { %v1155_v19 = vadd.f32 %v1529_v18, %v1250_v40  ;;  %v1095_v45 = vpop.f32.mrb[21].mxu0 }
 0x41b   :  { %v1153_v22 = vadd.f32 %v1250_v40, %v1095_v45  ;;  %v1530_v46 = vpop.f32.mrb[22].mxu0 }
 0x41c   :  { %1171 = vst [vmem:[#allocation13 + $0x30] sm:$0xff] %v1155_v19  ;;  %v1156_v47 = vadd.f32 %v1530_v46, %v1250_v40  ;;  %v1098_v48 = vpop.f32.mrb[23].mxu0 }
 0x41d   :  { %1169 = vst [vmem:[#allocation13 + $0x20] sm:$0xff] %v1153_v22  ;;  %v1154_v49 = vadd.f32 %v1250_v40, %v1098_v48 }
 0x41e   :  { %1172 = vst [vmem:[#allocation13 + $0x38] sm:$0xff] %v1156_v47 }
 0x41f   :  { %1170 = vst [vmem:[#allocation13 + $0x28] sm:$0xff] %v1154_v49 }
 0x421   :  { %v1533_v50 = vpop.f32.mrb[24].mxu0 }
 0x422   :  { %v1159_v51 = vadd.f32 %v1533_v50, %v1250_v40  ;;  %v1111_v52 = vpop.f32.mrb[25].mxu0 }
 0x423   :  { %v1157_v53 = vadd.f32 %v1250_v40, %v1111_v52  ;;  %v1534_v54 = vpop.f32.mrb[26].mxu0 }
 0x424   :  { %1175 = vst [vmem:[#allocation13 + $0x50] sm:$0xff] %v1159_v51  ;;  %v1160_v55 = vadd.f32 %v1534_v54, %v1250_v40  ;;  %v1114_v56 = vpop.f32.mrb[27].mxu0 }
 0x425   :  { %1173 = vst [vmem:[#allocation13 + $0x40] sm:$0xff] %v1157_v53  ;;  %v1158_v57 = vadd.f32 %v1250_v40, %v1114_v56 }
 0x426   :  { %1176 = vst [vmem:[#allocation13 + $0x58] sm:$0xff] %v1160_v55 }
 0x427   :  { %1174 = vst [vmem:[#allocation13 + $0x48] sm:$0xff] %v1158_v57 }
 0x429   :  { %v1537_v58 = vpop.f32.mrb[28].mxu0 }
 0x42a   :  { %v1163_v59 = vadd.f32 %v1537_v58, %v1250_v40  ;;  %v1127_v60 = vpop.f32.mrb[29].mxu0 }
 0x42b   :  { %v1161_v61 = vadd.f32 %v1250_v40, %v1127_v60  ;;  %v1538_v62 = vpop.f32.mrb[30].mxu0 }
 0x42c   :  { %1179 = vst [vmem:[#allocation13 + $0x70] sm:$0xff] %v1163_v59  ;;  %v1164_v63 = vadd.f32 %v1538_v62, %v1250_v40  ;;  %v1130_v0 = vpop.f32.mrb[31].mxu0 }
 0x42d   :  { %1177 = vst [vmem:[#allocation13 + $0x60] sm:$0xff] %v1161_v61  ;;  %v1162_v2 = vadd.f32 %v1250_v40, %v1130_v0 }
 0x42e   :  { %1180 = vst [vmem:[#allocation13 + $0x78] sm:$0xff] %v1164_v63 }
 0x42f   :  { %1178 = vst [vmem:[#allocation13 + $0x68] sm:$0xff] %v1162_v2 }
 0x430   :  { %1773 = shalt.err (!%p1770_p10)
}
 0x431   :  { %s1774_s14 = scalar_lea.hbm %s2080_s8, 2048 }
 0x432   :  { %p1775_p11 = scmp.ne.s32.totalorder %s2080_s8, %s1774_s14  ;;  %p1778_p12 = scmp.lt.u32.totalorder %s1774_s14, %s2080_s8 }
 0x434   :  { %p1780_p13 = pnand %p1778_p12, %p1775_p11 }
 0x436   :  { %1783 = shalt.err (!%p1780_p13)
}
 0x437   :  { %s1803_s21 = smov 128   ;;  %s1804_s3 = smov 8  }
 0x438   :  { %1192 = dma.vmem_to_hbm [thread:$0]  %s1187_s9, 2048, %s2080_s8, [#allocation4], %s1803_s21, %s1803_s21, %s1804_s3  }
 0x439   :  { %1792 = dma.done.wait [#allocation4], 2048  }
 0x43a   :  { %1793 = vsyncadd [#allocation4], 4294965248 }
 0x43b   :  { %1196 = vsyncpa [#allocation3], 1 }
 0x43c   :  { %1197 = vsyncpa [#allocation6], 1 }
 0x43d   :  { %1198 = vsyncpa [#allocation9], 1 }
 0x43e   :  { %1199 = vsyncpa [#allocation12], 1 }
 0x43f   :  { %1200 = vsyncpa [#allocation4], 1 }

</bundles_post_ra>
